<compile_context>
chip_gen: v7x
topology: tpu7x:2x2x1
jax: 0.10.0
libtpu: 0.0.40
codegen_flags: <defaults>
</compile_context>

<pallas_src>
import jax
import jax.numpy as jnp
from jax.experimental import pallas as pl
from jax.experimental.pallas import tpu as pltpu


# ---------------------------------------------------------------------------
# Kernel
# ---------------------------------------------------------------------------
def _sae_fwd_kernel(x_ref, w_enc_ref, w_dec_ref, b_enc_ref, b_dec_ref,
                    acts_ref, xrec_ref, rec_ref, l1_ref, l0_ref,
                    xc_ref):
    j = pl.program_id(1)
    nj = pl.num_programs(1)

    @pl.when(j == 0)
    def _init():
        # Hoisted centering: one VPU subtract + bf16 pack per batch tile,
        # reused for every d_sae block.
        xc_ref[...] = (x_ref[...] - b_dec_ref[...]).astype(jnp.bfloat16)
        # xrec output block is resident across j -> use it as the accumulator.
        xrec_ref[...] = jnp.zeros_like(xrec_ref)
        l1_ref[...] = jnp.zeros_like(l1_ref)
        l0_ref[...] = jnp.zeros_like(l0_ref)

    # encode: this d_sae block of the hidden layer (MXU, f32 accumulate)
    hidden = jnp.dot(xc_ref[...], w_enc_ref[...],
                     preferred_element_type=jnp.float32)        # (TB, TD) f32
    acts = jnp.maximum(hidden + b_enc_ref[...], 0.0)            # (TB, TD) f32

    # lane-axis reductions on the live acts block (XLU; overlaps MXU work).
    # acts >= 0 after ReLU, so |acts| == acts.
    l1_ref[...] += jnp.sum(acts, axis=-1, keepdims=True)
    l0_ref[...] += jnp.sum((acts > 1e-6).astype(jnp.float32),
                           axis=-1, keepdims=True)

    acts_ref[...] = acts.astype(acts_ref.dtype)

    # decode: accumulate this block's contribution directly in the resident
    # f32 output block (no separate scratch).
    xrec_ref[...] += jnp.dot(acts.astype(jnp.bfloat16), w_dec_ref[...],
                             preferred_element_type=jnp.float32)

    @pl.when(j == nj - 1)
    def _finalize():
        x_rec = xrec_ref[...] + b_dec_ref[...]
        xrec_ref[...] = x_rec
        diff = x_rec - x_ref[...]
        rec_ref[...] = jnp.sum(diff * diff, axis=-1, keepdims=True)


# ---------------------------------------------------------------------------
# Wrapper helpers
# ---------------------------------------------------------------------------
def _pick_tile(dim, target, align):
    """Largest `align`-multiple <= target that divides `dim` (fallback: dim)."""
    if dim <= target:
        return dim
    t = (min(target, dim) // align) * align
    while t >= align:
        if dim % t == 0:
            return t
        t -= align
    return dim


def _vmem_capacity_bytes():
    try:
        return int(pltpu.get_tpu_info().vmem_capacity_bytes)
    except Exception:
        return 128 * 1024 * 1024  # conservative default (v5e/v6e)


# ---------------------------------------------------------------------------
# Wrapper
# ---------------------------------------------------------------------------
def sae_forward(x, w_enc, w_dec, b_enc, b_dec, l1_coefficient,
                *, tb=None, td=None, acts_dtype=jnp.float32):
    orig_shape = x.shape
    d_in = orig_shape[-1]
    d_sae = w_enc.shape[1]
    x2 = x.reshape(-1, d_in).astype(jnp.float32)
    B = x2.shape[0]

    vmem_cap = _vmem_capacity_bytes()
    big_vmem = vmem_cap >= 100 * 1024 * 1024   # v5e/v6e: 128 MiB; v7x: 64 MiB

    # Batch tile sets arithmetic intensity (weights re-stream per batch tile):
    # go bigger on 128-MiB chips; keep 256 on v7x (its HBM/flops ridge is lower)
    # and shrink td first for large d_in.
    if tb is None:
        tb_target = 512 if big_vmem else 256
        tb = _pick_tile(B, tb_target, 8)
        # v7x has 2 TensorCores: make sure the "parallel" batch axis has >= 2
        # tiles so both cores get work.
        if not big_vmem and (B // tb) < 2 and B >= 16:
            tb = _pick_tile(B, max(8, (B // 2 // 8) * 8), 8)
    if td is None:
        td_target = 512 if (big_vmem or d_in < 4096) else 256
        td = _pick_tile(d_sae, td_target, 128)
    assert B % tb == 0 and d_sae % td == 0, (B, tb, d_sae, td)

    # bf16 weights: MXU-native operands + half the HBM/VMEM weight traffic.
    w_enc_bf = w_enc.astype(jnp.bfloat16)
    w_dec_bf = w_dec.astype(jnp.bfloat16)
    b_enc2 = b_enc.reshape(1, d_sae).astype(jnp.float32)
    b_dec2 = b_dec.reshape(1, d_in).astype(jnp.float32)

    grid = (B // tb, d_sae // td)
    n_btiles = grid[0]
    acts_bytes = jnp.dtype(acts_dtype).itemsize

    # Rough VMEM footprint (double-buffered streamed tiles + resident blocks
    # + the bf16 centering scratch), then clamp below physical with headroom.
    est = (2 * (tb * d_in * 4             # x tile
                + d_in * td * 2           # W_enc tile (bf16)
                + td * d_in * 2           # W_dec tile (bf16)
                + 8 * max(td, 128) * 4    # b_enc tile (padded)
                + 8 * max(d_in, 128) * 4  # b_dec tile (padded)
                + tb * td * acts_bytes    # acts tile
                + tb * d_in * 4           # x_rec tile (resident accumulator)
                + 3 * tb * 128 * 4)       # per-item loss tiles (padded)
           + tb * d_in * 2)               # x_c centering scratch (bf16)
    vmem_limit = max(est + (4 << 20), 32 << 20)
    vmem_limit = int(min(vmem_limit, vmem_cap - (16 << 20)))

    cost = pl.CostEstimate(
        flops=4 * B * d_in * d_sae,       # two matmuls, 2 flops/MAC
        transcendentals=0,
        bytes_accessed=(B * d_in * 4                           # x
                        + n_btiles * 2 * d_in * d_sae * 2      # W_enc+W_dec re-streamed
                        + n_btiles * (d_sae * 4 + d_in * 4)    # biases per batch tile
                        + B * d_sae * acts_bytes               # acts out
                        + B * d_in * 4                         # x_reconstructed out
                        + 3 * B * 4),                          # per-item reductions
    )

    acts, x_rec, rec_pi, l1_pi, l0_pi = pl.pallas_call(
        _sae_fwd_kernel,
        out_shape=(
            jax.ShapeDtypeStruct((B, d_sae), acts_dtype),    # activations
            jax.ShapeDtypeStruct((B, d_in), jnp.float32),    # x_reconstructed
            jax.ShapeDtypeStruct((B, 1), jnp.float32),       # recons loss / item
            jax.ShapeDtypeStruct((B, 1), jnp.float32),       # L1 / item
            jax.ShapeDtypeStruct((B, 1), jnp.float32),       # L0 / item
        ),
        grid=grid,
        in_specs=[
            pl.BlockSpec((tb, d_in), lambda bi, j: (bi, 0)),   # x (resident over j)
            pl.BlockSpec((d_in, td), lambda bi, j: (0, j)),    # W_enc block
            pl.BlockSpec((td, d_in), lambda bi, j: (j, 0)),    # W_dec block
            pl.BlockSpec((1, td),    lambda bi, j: (0, j)),    # b_enc block
            pl.BlockSpec((1, d_in),  lambda bi, j: (0, 0)),    # b_dec
        ],
        out_specs=(
            pl.BlockSpec((tb, td),   lambda bi, j: (bi, j)),   # acts
            pl.BlockSpec((tb, d_in), lambda bi, j: (bi, 0)),   # x_rec (accumulated)
            pl.BlockSpec((tb, 1),    lambda bi, j: (bi, 0)),   # recons / item
            pl.BlockSpec((tb, 1),    lambda bi, j: (bi, 0)),   # L1 / item
            pl.BlockSpec((tb, 1),    lambda bi, j: (bi, 0)),   # L0 / item
        ),
        scratch_shapes=[pltpu.VMEM((tb, d_in), jnp.bfloat16)],  # centered x (bf16)
        compiler_params=pltpu.CompilerParams(
            # d_sae axis MUST stay "arbitrary": it carries the accumulator.
            dimension_semantics=("parallel", "arbitrary"),
            vmem_limit_bytes=vmem_limit,
        ),
        cost_estimate=cost,
    )(x2, w_enc_bf, w_dec_bf, b_enc2, b_dec2)

    # batch means + scalar bookkeeping (glue, not hot path)
    recons_loss = jnp.mean(rec_pi)
    l1_loss = l1_coefficient * jnp.mean(l1_pi)
    total_loss = recons_loss + l1_loss
    l0_norm = jnp.mean(l0_pi)
    sparsity_fraction = l0_norm / d_sae

    lead = orig_shape[:-1]
    return {
        "loss": total_loss,
        "reconstruction_loss": recons_loss,
        "l1_loss": l1_loss,
        "x_reconstructed": x_rec.reshape(*lead, d_in),
        "activations": acts.reshape(*lead, d_sae),
        "l0_norm": l0_norm,
        "sparsity_fraction": sparsity_fraction,
    }


# ---------------------------------------------------------------------------
# Parameter init (mirrors the PyTorch __init__)
# ---------------------------------------------------------------------------
def init_params(key, d_in, d_sae):
    k_enc, k_dec = jax.random.split(key)
    w_enc = jax.random.normal(k_enc, (d_in, d_sae), jnp.float32) * jnp.sqrt(2.0 / d_in)
    w_dec_raw = jax.random.normal(k_dec, (d_sae, d_in), jnp.float32)
    # F.normalize(..., p=2, dim=0): unit L2 norm along the d_sae axis (columns)
    col_norm = jnp.sqrt(jnp.sum(w_dec_raw * w_dec_raw, axis=0, keepdims=True))
    w_dec = w_dec_raw / jnp.maximum(col_norm, 1e-12)
    b_enc = jnp.zeros((1, d_sae), jnp.float32)
    b_dec = jnp.zeros((1, d_in), jnp.float32)
    return w_enc, w_dec, b_enc, b_dec


# ---------------------------------------------------------------------------
# Pure-JAX reference (same bf16 matmul precision as the kernel)
# ---------------------------------------------------------------------------
def reference_forward(x, w_enc_bf, w_dec_bf, b_enc, b_dec, l1_coefficient):
    x_c = (x - b_dec).astype(jnp.bfloat16)
    acts = jnp.maximum(
        jnp.dot(x_c, w_enc_bf, preferred_element_type=jnp.float32) + b_enc, 0.0)
    x_rec = jnp.dot(acts.astype(jnp.bfloat16), w_dec_bf,
                    preferred_element_type=jnp.float32) + b_dec
    recons = jnp.mean(jnp.sum((x_rec - x) ** 2, axis=-1))
    l1 = l1_coefficient * jnp.mean(jnp.sum(jnp.abs(acts), axis=-1))
    l0 = jnp.mean(jnp.sum((acts > 1e-6).astype(jnp.float32), axis=-1))
    return {
        "loss": recons + l1,
        "reconstruction_loss": recons,
        "l1_loss": l1,
        "x_reconstructed": x_rec,
        "activations": acts,
        "l0_norm": l0,
        "sparsity_fraction": l0 / w_enc_bf.shape[1],
    }


if __name__ == "__main__":
    # Small but non-trivial shapes: 2 batch tiles x 2 d_sae tiles exercise the
    # init/accumulate/finalize grid path and the parallel batch axis.
    B, D_IN, D_SAE = 16, 128, 256
    TB, TD = 8, 128
    L1_COEFF = 1e-3

    key = jax.random.PRNGKey(0)
    k_param, k_x = jax.random.split(key)
    w_enc, w_dec, b_enc, b_dec = init_params(k_param, D_IN, D_SAE)
    x = jax.random.normal(k_x, (B, D_IN), jnp.float32)

    out = sae_forward(x, w_enc, w_dec, b_enc, b_dec, L1_COEFF, tb=TB, td=TD)
    out = jax.tree_util.tree_map(jax.block_until_ready, out)

    # Compare against a reference that uses the same bf16 matmul precision
    # (documented precision trade-off vs. the pure-f32 PyTorch module).
    ref = reference_forward(x, w_enc.astype(jnp.bfloat16),
                            w_dec.astype(jnp.bfloat16), b_enc, b_dec, L1_COEFF)

    for name in ("loss", "reconstruction_loss", "l1_loss",
                 "x_reconstructed", "activations"):
        assert jnp.allclose(out[name], ref[name], rtol=1e-3, atol=1e-3), name
    assert jnp.allclose(out["l0_norm"], ref["l0_norm"], atol=0.1), "l0_norm"
    assert jnp.allclose(out["sparsity_fraction"], ref["sparsity_fraction"],
                        atol=1e-3), "sparsity_fraction"

    print("KERNEL_OK")
</pallas_src>

<mosaic_0001>
module attributes {stable_mosaic.version = 11 : i64} {
  func.func @_sae_fwd_kernel(%arg0: i32, %arg1: i32, %arg2: memref<8x128xf32, #tpu.memory_space<vmem>>, %arg3: memref<128x128xbf16, #tpu.memory_space<vmem>>, %arg4: memref<128x128xbf16, #tpu.memory_space<vmem>>, %arg5: memref<1x128xf32, #tpu.memory_space<vmem>>, %arg6: memref<1x128xf32, #tpu.memory_space<vmem>>, %arg7: memref<8x128xf32, #tpu.memory_space<vmem>>, %arg8: memref<8x128xf32, #tpu.memory_space<vmem>>, %arg9: memref<8x1xf32, #tpu.memory_space<vmem>>, %arg10: memref<8x1xf32, #tpu.memory_space<vmem>>, %arg11: memref<8x1xf32, #tpu.memory_space<vmem>>, %arg12: memref<8x128xbf16, #tpu.memory_space<vmem>>) attributes {dimension_semantics = [#tpu.dimension_semantics<parallel>, #tpu.dimension_semantics<arbitrary>], iteration_bounds = array<i64: 2, 2>, scalar_prefetch = 0 : i64, scratch_operands = 1 : i64, tpu.core_type = #tpu.core_type<tc>, window_params = [{transform_indices = @transform_0, window_bounds = array<i64: 8, 128>}, {transform_indices = @transform_1, window_bounds = array<i64: 128, 128>}, {transform_indices = @transform_2, window_bounds = array<i64: 128, 128>}, {transform_indices = @transform_3, window_bounds = array<i64: 1, 128>}, {pipeline_mode = #tpu.pipeline_mode<synchronous>, transform_indices = @transform_4, window_bounds = array<i64: 1, 128>}, {transform_indices = @transform_5, window_bounds = array<i64: 8, 128>}, {transform_indices = @transform_6, window_bounds = array<i64: 8, 128>}, {transform_indices = @transform_7, window_bounds = array<i64: 8, 1>}, {transform_indices = @transform_8, window_bounds = array<i64: 8, 1>}, {transform_indices = @transform_9, window_bounds = array<i64: 8, 1>}]} {
    %c0_i32 = arith.constant 0 : i32
    %0 = arith.cmpi eq, %arg1, %c0_i32 : i32
    %1 = arith.extui %0 : i1 to i32
    %c0_i32_0 = arith.constant 0 : i32
    %2 = arith.cmpi ne, %1, %c0_i32_0 : i32
    scf.if %2 {
      %c0_28 = arith.constant 0 : index
      %c0_29 = arith.constant 0 : index
      %35 = vector.load %arg2[%c0_28, %c0_29] : memref<8x128xf32, #tpu.memory_space<vmem>>, vector<8x128xf32>
      %c0_30 = arith.constant 0 : index
      %c0_31 = arith.constant 0 : index
      %36 = vector.load %arg6[%c0_30, %c0_31] : memref<1x128xf32, #tpu.memory_space<vmem>>, vector<1x128xf32>
      %37 = vector.broadcast %36 : vector<1x128xf32> to vector<8x128xf32>
      %38 = arith.subf %35, %37 : vector<8x128xf32>
      %39 = arith.truncf %38 : vector<8x128xf32> to vector<8x128xbf16>
      %c0_32 = arith.constant 0 : index
      %c0_33 = arith.constant 0 : index
      %40 = vector.load %arg12[%c0_32, %c0_33] : memref<8x128xbf16, #tpu.memory_space<vmem>>, vector<8x128xbf16>
      tpu.vector_store %arg12[%c0_32, %c0_33], %39 {strides = array<i32>} : memref<8x128xbf16, #tpu.memory_space<vmem>>, vector<8x128xbf16>,
      %cst_34 = arith.constant 0.000000e+00 : f32
      %41 = vector.broadcast %cst_34 : f32 to vector<8x128xf32>
      %c0_35 = arith.constant 0 : index
      %c0_36 = arith.constant 0 : index
      %42 = vector.load %arg8[%c0_35, %c0_36] : memref<8x128xf32, #tpu.memory_space<vmem>>, vector<8x128xf32>
      tpu.vector_store %arg8[%c0_35, %c0_36], %41 {strides = array<i32>} : memref<8x128xf32, #tpu.memory_space<vmem>>, vector<8x128xf32>,
      %cst_37 = arith.constant 0.000000e+00 : f32
      %43 = vector.broadcast %cst_37 : f32 to vector<8x1xf32>
      %c0_38 = arith.constant 0 : index
      %c0_39 = arith.constant 0 : index
      %44 = vector.load %arg10[%c0_38, %c0_39] : memref<8x1xf32, #tpu.memory_space<vmem>>, vector<8x1xf32>
      tpu.vector_store %arg10[%c0_38, %c0_39], %43 {strides = array<i32>} : memref<8x1xf32, #tpu.memory_space<vmem>>, vector<8x1xf32>,
      %cst_40 = arith.constant 0.000000e+00 : f32
      %45 = vector.broadcast %cst_40 : f32 to vector<8x1xf32>
      %c0_41 = arith.constant 0 : index
      %c0_42 = arith.constant 0 : index
      %46 = vector.load %arg11[%c0_41, %c0_42] : memref<8x1xf32, #tpu.memory_space<vmem>>, vector<8x1xf32>
      tpu.vector_store %arg11[%c0_41, %c0_42], %45 {strides = array<i32>} : memref<8x1xf32, #tpu.memory_space<vmem>>, vector<8x1xf32>,
    } else {
    }
    %c0 = arith.constant 0 : index
    %c0_1 = arith.constant 0 : index
    %3 = vector.load %arg12[%c0, %c0_1] : memref<8x128xbf16, #tpu.memory_space<vmem>>, vector<8x128xbf16>
    %c0_2 = arith.constant 0 : index
    %c0_3 = arith.constant 0 : index
    %4 = vector.load %arg3[%c0_2, %c0_3] : memref<128x128xbf16, #tpu.memory_space<vmem>>, vector<128x128xbf16>
    %cst = arith.constant dense<0.000000e+00> : vector<8x128xf32>
    %5 = tpu.matmul %3, %4, %cst {dimension_numbers = #tpu.dot_dimension_numbers<[1], [0], [0], [1], [0, 0, 1, 1], [], []>} : vector<8x128xbf16>, vector<128x128xbf16>, vector<8x128xf32> -> vector<8x128xf32>
    %c0_4 = arith.constant 0 : index
    %c0_5 = arith.constant 0 : index
    %6 = vector.load %arg5[%c0_4, %c0_5] : memref<1x128xf32, #tpu.memory_space<vmem>>, vector<1x128xf32>
    %7 = vector.broadcast %6 : vector<1x128xf32> to vector<8x128xf32>
    %8 = arith.addf %5, %7 : vector<8x128xf32>
    %cst_6 = arith.constant 0.000000e+00 : f32
    %9 = vector.broadcast %cst_6 : f32 to vector<8x128xf32>
    %10 = arith.maximumf %8, %9 : vector<8x128xf32>
    %c0_7 = arith.constant 0 : index
    %c0_8 = arith.constant 0 : index
    %11 = vector.load %arg10[%c0_7, %c0_8] : memref<8x1xf32, #tpu.memory_space<vmem>>, vector<8x1xf32>
    %cst_9 = arith.constant dense<0.000000e+00> : vector<8xf32>
    %12 = vector.multi_reduction <add>, %10, %cst_9 [1] : vector<8x128xf32> to vector<8xf32>
    %13 = vector.shape_cast %12 : vector<8xf32> to vector<8x1xf32>
    %14 = arith.addf %11, %13 : vector<8x1xf32>
    %c0_10 = arith.constant 0 : index
    %c0_11 = arith.constant 0 : index
    %15 = vector.load %arg10[%c0_10, %c0_11] : memref<8x1xf32, #tpu.memory_space<vmem>>, vector<8x1xf32>
    tpu.vector_store %arg10[%c0_10, %c0_11], %14 {strides = array<i32>} : memref<8x1xf32, #tpu.memory_space<vmem>>, vector<8x1xf32>,
    %c0_12 = arith.constant 0 : index
    %c0_13 = arith.constant 0 : index
    %16 = vector.load %arg11[%c0_12, %c0_13] : memref<8x1xf32, #tpu.memory_space<vmem>>, vector<8x1xf32>
    %cst_14 = arith.constant 9.99999997E-7 : f32
    %17 = vector.broadcast %cst_14 : f32 to vector<8x128xf32>
    %18 = arith.cmpf ogt, %10, %17 : vector<8x128xf32>
    %19 = arith.extui %18 : vector<8x128xi1> to vector<8x128xi32>
    %20 = arith.sitofp %19 : vector<8x128xi32> to vector<8x128xf32>
    %cst_15 = arith.constant dense<0.000000e+00> : vector<8xf32>
    %21 = vector.multi_reduction <add>, %20, %cst_15 [1] : vector<8x128xf32> to vector<8xf32>
    %22 = vector.shape_cast %21 : vector<8xf32> to vector<8x1xf32>
    %23 = arith.addf %16, %22 : vector<8x1xf32>
    %c0_16 = arith.constant 0 : index
    %c0_17 = arith.constant 0 : index
    %24 = vector.load %arg11[%c0_16, %c0_17] : memref<8x1xf32, #tpu.memory_space<vmem>>, vector<8x1xf32>
    tpu.vector_store %arg11[%c0_16, %c0_17], %23 {strides = array<i32>} : memref<8x1xf32, #tpu.memory_space<vmem>>, vector<8x1xf32>,
    %c0_18 = arith.constant 0 : index
    %c0_19 = arith.constant 0 : index
    %25 = vector.load %arg7[%c0_18, %c0_19] : memref<8x128xf32, #tpu.memory_space<vmem>>, vector<8x128xf32>
    tpu.vector_store %arg7[%c0_18, %c0_19], %10 {strides = array<i32>} : memref<8x128xf32, #tpu.memory_space<vmem>>, vector<8x128xf32>,
    %c0_20 = arith.constant 0 : index
    %c0_21 = arith.constant 0 : index
    %26 = vector.load %arg8[%c0_20, %c0_21] : memref<8x128xf32, #tpu.memory_space<vmem>>, vector<8x128xf32>
    %27 = arith.truncf %10 : vector<8x128xf32> to vector<8x128xbf16>
    %c0_22 = arith.constant 0 : index
    %c0_23 = arith.constant 0 : index
    %28 = vector.load %arg4[%c0_22, %c0_23] : memref<128x128xbf16, #tpu.memory_space<vmem>>, vector<128x128xbf16>
    %cst_24 = arith.constant dense<0.000000e+00> : vector<8x128xf32>
    %29 = tpu.matmul %27, %28, %cst_24 {dimension_numbers = #tpu.dot_dimension_numbers<[1], [0], [0], [1], [0, 0, 1, 1], [], []>} : vector<8x128xbf16>, vector<128x128xbf16>, vector<8x128xf32> -> vector<8x128xf32>
    %30 = arith.addf %26, %29 : vector<8x128xf32>
    %c0_25 = arith.constant 0 : index
    %c0_26 = arith.constant 0 : index
    %31 = vector.load %arg8[%c0_25, %c0_26] : memref<8x128xf32, #tpu.memory_space<vmem>>, vector<8x128xf32>
    tpu.vector_store %arg8[%c0_25, %c0_26], %30 {strides = array<i32>} : memref<8x128xf32, #tpu.memory_space<vmem>>, vector<8x128xf32>,
    %c1_i32 = arith.constant 1 : i32
    %32 = arith.cmpi eq, %arg1, %c1_i32 : i32
    %33 = arith.extui %32 : i1 to i32
    %c0_i32_27 = arith.constant 0 : i32
    %34 = arith.cmpi ne, %33, %c0_i32_27 : i32
    scf.if %34 {
      %c0_28 = arith.constant 0 : index
      %c0_29 = arith.constant 0 : index
      %35 = vector.load %arg8[%c0_28, %c0_29] : memref<8x128xf32, #tpu.memory_space<vmem>>, vector<8x128xf32>
      %c0_30 = arith.constant 0 : index
      %c0_31 = arith.constant 0 : index
      %36 = vector.load %arg6[%c0_30, %c0_31] : memref<1x128xf32, #tpu.memory_space<vmem>>, vector<1x128xf32>
      %37 = vector.broadcast %36 : vector<1x128xf32> to vector<8x128xf32>
      %38 = arith.addf %35, %37 : vector<8x128xf32>
      %c0_32 = arith.constant 0 : index
      %c0_33 = arith.constant 0 : index
      %39 = vector.load %arg8[%c0_32, %c0_33] : memref<8x128xf32, #tpu.memory_space<vmem>>, vector<8x128xf32>
      tpu.vector_store %arg8[%c0_32, %c0_33], %38 {strides = array<i32>} : memref<8x128xf32, #tpu.memory_space<vmem>>, vector<8x128xf32>,
      %c0_34 = arith.constant 0 : index
      %c0_35 = arith.constant 0 : index
      %40 = vector.load %arg2[%c0_34, %c0_35] : memref<8x128xf32, #tpu.memory_space<vmem>>, vector<8x128xf32>
      %41 = arith.subf %38, %40 : vector<8x128xf32>
      %42 = arith.mulf %41, %41 : vector<8x128xf32>
      %cst_36 = arith.constant dense<0.000000e+00> : vector<8xf32>
      %43 = vector.multi_reduction <add>, %42, %cst_36 [1] : vector<8x128xf32> to vector<8xf32>
      %44 = vector.shape_cast %43 : vector<8xf32> to vector<8x1xf32>
      %c0_37 = arith.constant 0 : index
      %c0_38 = arith.constant 0 : index
      %45 = vector.load %arg9[%c0_37, %c0_38] : memref<8x1xf32, #tpu.memory_space<vmem>>, vector<8x1xf32>
      tpu.vector_store %arg9[%c0_37, %c0_38], %44 {strides = array<i32>} : memref<8x1xf32, #tpu.memory_space<vmem>>, vector<8x1xf32>,
    } else {
    }
    return
  }
  func.func @transform_0(%arg0: i32, %arg1: i32) -> (i32, i32) {
    %c0_i32 = arith.constant 0 : i32
    %c0_i32_0 = arith.constant 0 : i32
    return %arg0, %c0_i32 : i32, i32
  }
  func.func @transform_1(%arg0: i32, %arg1: i32) -> (i32, i32) {
    %c0_i32 = arith.constant 0 : i32
    %c0_i32_0 = arith.constant 0 : i32
    return %c0_i32, %arg1 : i32, i32
  }
  func.func @transform_2(%arg0: i32, %arg1: i32) -> (i32, i32) {
    %c0_i32 = arith.constant 0 : i32
    %c0_i32_0 = arith.constant 0 : i32
    return %arg1, %c0_i32 : i32, i32
  }
  func.func @transform_3(%arg0: i32, %arg1: i32) -> (i32, i32) {
    %c0_i32 = arith.constant 0 : i32
    %c0_i32_0 = arith.constant 0 : i32
    return %c0_i32, %arg1 : i32, i32
  }
  func.func @transform_4(%arg0: i32, %arg1: i32) -> (i32, i32) {
    %c0_i32 = arith.constant 0 : i32
    %c0_i32_0 = arith.constant 0 : i32
    %c0_i32_1 = arith.constant 0 : i32
    return %c0_i32, %c0_i32_0 : i32, i32
  }
  func.func @transform_5(%arg0: i32, %arg1: i32) -> (i32, i32) {
    %c0_i32 = arith.constant 0 : i32
    return %arg0, %arg1 : i32, i32
  }
  func.func @transform_6(%arg0: i32, %arg1: i32) -> (i32, i32) {
    %c0_i32 = arith.constant 0 : i32
    %c0_i32_0 = arith.constant 0 : i32
    return %arg0, %c0_i32 : i32, i32
  }
  func.func @transform_7(%arg0: i32, %arg1: i32) -> (i32, i32) {
    %c0_i32 = arith.constant 0 : i32
    %c0_i32_0 = arith.constant 0 : i32
    return %arg0, %c0_i32 : i32, i32
  }
  func.func @transform_8(%arg0: i32, %arg1: i32) -> (i32, i32) {
    %c0_i32 = arith.constant 0 : i32
    %c0_i32_0 = arith.constant 0 : i32
    return %arg0, %c0_i32 : i32, i32
  }
  func.func @transform_9(%arg0: i32, %arg1: i32) -> (i32, i32) {
    %c0_i32 = arith.constant 0 : i32
    %c0_i32_0 = arith.constant 0 : i32
    return %arg0, %c0_i32 : i32, i32
  }
}

</mosaic_0001>

<bundles_post_ra>
// kernel: tpu_custom_call.1
= control target key start
LH: loop header
LB: loop body
LE: loop exit
PB: predicated region body
PF: predicated region fallthrough
CT: control target
= control target key end

     0   :  { %s2203_s0 = inlined_call_operand.hbm [shape: f32[16,128], index: 0, kind: input, shape index: {}]   ;;  %s2204_s1 = inlined_call_operand.hbm [shape: bf16[128,256], index: 1, kind: input, shape index: {}]   ;;  %s2205_s2 = inlined_call_operand.hbm [shape: bf16[256,128], index: 2, kind: input, shape index: {}]   ;;  %s2206_s3 = inlined_call_operand.vmem [shape: f32[1,256], index: 3, kind: input, shape index: {}]   ;;  %s2207_s4 = inlined_call_operand.vmem [shape: f32[1,128], index: 4, kind: input, shape index: {}]   ;;  %s2208_s5 = inlined_call_operand.hbm [shape: f32[16,256], index: 5, kind: output, shape index: {0}]   ;;  %s2209_s6 = inlined_call_operand.hbm [shape: f32[16,128], index: 6, kind: output, shape index: {1}]   ;;  %s2210_s7 = inlined_call_operand.vmem [shape: f32[16,1], index: 7, kind: output, shape index: {2}]   ;;  %s2211_s8 = inlined_call_operand.vmem [shape: f32[16,1], index: 8, kind: output, shape index: {3}]   ;;  %s2212_s9 = inlined_call_operand.vmem [shape: f32[16,1], index: 9, kind: output, shape index: {4}]  }
   0x1   :  { %2242 = sst [smem:[#allocation33_spill]] %s2203_s0 }
   0x2   :  { %2243 = sst [smem:[#allocation34_spill]] %s2204_s1 }
   0x3   :  { %2244 = sst [smem:[#allocation35_spill]] %s2205_s2 }
   0x4   :  { %2245 = sst [smem:[#allocation36_spill]] %s2206_s3 }
   0x5   :  { %2246 = sst [smem:[#allocation37_spill]] %s2207_s4 }
   0x6   :  { %2247 = sst [smem:[#allocation38_spill]] %s2208_s5 }
   0x7   :  { %2248 = sst [smem:[#allocation39_spill]] %s2209_s6 }
   0x8   :  { %2249 = sst [smem:[#allocation40_spill]] %s2210_s7 }
   0x9   :  { %2250 = sst [smem:[#allocation41_spill]] %s2211_s8 }
   0xa   :  { %2251 = sst [smem:[#allocation42_spill]] %s2212_s9 }
   0xb   :  { %15 = vsyncpa [#allocation4], 0 }
   0xc   :  { %17 = vsyncpa [#allocation4 + $0x1], 0 }
   0xd   :  { %18 = vsyncpa [#allocation7], 0 }
   0xe   :  { %20 = vsyncpa [#allocation7 + $0x1], 0 }
   0xf   :  { %21 = vsyncpa [#allocation5], 0 }
  0x10   :  { %23 = vsyncpa [#allocation5 + $0x1], 0 }
  0x11   :  { %24 = vsyncpa [#allocation11], 0 }
  0x12   :  { %26 = vsyncpa [#allocation11 + $0x1], 0  ;;  %s1670_s30 = smov 0   ;;  %s1672_s10 = smov 0  }
  0x13   :  { %s1674_s11 = smov 0   ;;  %s1676_s12 = smov 0  }
  0x14   :  { %s1678_s13 = smov 0   ;;  %s1680_s14 = smov 0  }
  0x15   :  { %s1682_s15 = smov 0   ;;  %s1684_s16 = smov 0  }
  0x16   :  { %s1686_s17 = smov 0   ;;  %s1688_s18 = smov 0  }
  0x17   :  { %s1690_s19 = smov 0   ;;  %s1692_s20 = smov 0  }
  0x18   :  { %s1694_s21 = smov 0   ;;  %s1696_s22 = smov 0  }
  0x19 LB: > { %2252 = sst [smem:[#allocation16_spill]] %s1563_s11  ;;  %p2216_p0 = scmp.eq.s32.totalorder %s1607_s22, 0  ;;  %s1607_s22 = sphi %s1696_s22, %s32_s22   ;;  %s1603_s21 = sphi %s1694_s21, %s2331_s21   ;;  %s1599_s20 = sphi %s1692_s20, %s2330_s20   ;;  %s1595_s19 = sphi %s1690_s19, %s2329_s19   ;;  %s1591_s18 = sphi %s1688_s18, %s2328_s18   ;;  %s1587_s17 = sphi %s1686_s17, %s2327_s17   ;;  %s1583_s16 = sphi %s1684_s16, %s2326_s16   ;;  %s1579_s15 = sphi %s1682_s15, %s2325_s15   ;;  %s1575_s14 = sphi %s1680_s14, %s2324_s14   ;;  %s1571_s13 = sphi %s1678_s13, %s2323_s13   ;;  %s1567_s12 = sphi %s1676_s12, %s2322_s12   ;;  %s1563_s11 = sphi %s1674_s11, %s2321_s11   ;;  %s1559_s10 = sphi %s1672_s10, %s2333_s10   ;;  %s1555_s30 = sphi %s1670_s30, %s2332_s30  }
  0x1a   : > { %2253 = sst [smem:[#allocation17_spill]] %s1571_s13  ;;  %p84_p1 = scmp.ne.s32.totalorder %s1575_s14, %s1571_s13 }
  0x1b   : > { %2254 = sst [smem:[#allocation18_spill]] %s1575_s14  ;;  %p2215_p2 = scmp.lt.s32.totalorder %s1607_s22, 4 }
  0x1c   : > { %2255 = sst [smem:[#allocation19_spill]] %s1579_s15  ;;  %p86_p3 = por %p84_p1, %p2216_p0 }
  0x1d   : > { %2256 = sst [smem:[#allocation20_spill]] %s1583_s16  ;;  %s340_s23 = sand.u32 1, %s1607_s22  }
  0x1e   : > { %2257 = sst [smem:[#allocation21_spill]] %s1587_s17  ;;  %s342_s24 = sand.u32 1, %s1575_s14  }
  0x1f   : > { %2258 = sst [smem:[#allocation22_spill]] %s1591_s18  ;;  %s1748_s25 = sshll.u32 %s342_s24, 6 }
  0x20   : > { %2259 = sst [smem:[#allocation23_spill]] %s1595_s19  ;;  %s1071_s26 = sshll.u32 %s1599_s20, 6 }
  0x21   : > { %2260 = sst [smem:[#allocation24_spill]] %s1599_s20  ;;  %s2262_s1 = sld [smem:[#allocation34_spill]] }
  0x22   : > { %2261 = sst [smem:[#allocation25_spill]] %s1603_s21  ;;  %s344_s6 = scalar_lea.vmem [#allocation6], %s1748_s25 }
  0x23   : > { %s350_s5 = sshll.u32 %s344_s6, 4  ;;  %p1759_p4 = pnand %p2215_p2, %p86_p3  ;;  %s1763_s5 = int_to_ptr.vmem [resolvable:$true] %s350_s5 }
  0x24   : > { %p1075_p5 = scmp.ge.s32.totalorder %s1607_s22, 1  ;;  %s1766_s24 = scalar_lea.sflag [#allocation7], %s340_s23 }
  0x25   : > { %p2223_p7 = pneg %p1759_p4 }
  0x27   : > { %s1754_s29 = scalar_lea.hbm %s2262_s1, %s1071_s26  ;;  %s1340_s28 = scalar_lea.hbm %s2262_s1, 2048 }
  0x28   : > { %s1335_s26 = scalar_lea.hbm %s1754_s29, 1024  ;;  %p1341_p10 = scmp.lt.u32.totalorder %s1754_s29, %s2262_s1 }
  0x29   : > { %p1336_p6 = scmp.ne.s32.totalorder %s1754_s29, %s1335_s26  ;;  %p1342_p11 = scmp.lt.u32.totalorder %s1340_s28, %s1335_s26 }
  0x2a   : > { %p1344_p13 = scmp.lt.u32.totalorder %s1335_s26, %s1754_s29 }
  0x2b   : > { %p1338_p8 = pnand %p2223_p7, %p1336_p6  ;;  %p1343_p12 = por %p1342_p11, %p1341_p10 }
  0x2d   : > { %p1339_p9 = pneg %p1338_p8  ;;  %p1345_p1 = por %p1344_p13, %p1343_p12 }
  0x2f   : > { %p1346_p3 = pnand %p1345_p1, %p1339_p9 }
  0x31   : > { %1349 = shalt.err (!%p1346_p3)
}
  0x32   : > { %s1350_s23 = scalar_lea.vmem %s1763_s5, 1024  ;;  %s1609_s6 = smov [#allocation6]  }
  0x33   : > { %p1351_p6 = scmp.ne.s32.totalorder %s1763_s5, %s1350_s23  ;;  %s1355_s27 = sshll.u32 %s1609_s6, 4  ;;  %s1356_s27 = int_to_ptr.vmem [resolvable:$false] %s1355_s27 }
  0x34   : > { %s1357_s8 = scalar_lea.vmem %s1356_s27, 2048  ;;  %p1358_p0 = scmp.lt.s32.totalorder %s1763_s5, %s1356_s27 }
  0x35   : > { %p1353_p8 = pnand %p1351_p6, %p2223_p7  ;;  %p1359_p10 = scmp.lt.s32.totalorder %s1357_s8, %s1350_s23 }
  0x37   : > { %p1354_p2 = pneg %p1353_p8  ;;  %p1360_p11 = por %p1359_p10, %p1358_p0 }
  0x39   : > { %p1361_p12 = pnand %p1360_p11, %p1354_p2 }
  0x3b   : > { %1364 = shalt.err (!%p1361_p12)
}
  0x3c   : > { %s1610_s9 = smov 128   ;;  %s2217_s26 = smov 64  }
  0x3d   : > { %s2218_s28 = smov 4   ;;  %p385_p0 = scmp.lt.s32.totalorder %s1607_s22, 5 }
  0x3e   : > { %1188 = dma.hbm_to_vmem [thread:$0]  (!%p1759_p4), %s1754_s29, 1024, %s1763_s5, %s1766_s24, %s1610_s9, %s2217_s26, %s2218_s28  }
  0x3f   : > { %p1799_p2 = pnand %p1075_p5, %p385_p0  ;;  %s1804_s6 = sadd.s32 4294967295, %s1607_s22  }
  0x40   : > { %s41_s8 = sadd.s32 1, %s1599_s20  ;;  %s44_s1 = sadd.s32 1, %s1603_s21 }
  0x41   : > { %s2264_s23 = scalar_select %p1799_p2, 1, 0 }
  0x42   : > { %p42_p9 = scmp.ge.s32.totalorder %s41_s8, 2  ;;  %s51_s5 = sadd.s32 1, %s1587_s17 }
  0x43   : > { %p2225_p13 = scmp.ne.s32.totalorder %s1587_s17, %s1583_s16  ;;  %p2224_p1 = scmp.ne.s32.totalorder %s1583_s16, %s1579_s15 }
  0x44   : > { %s2335_s8 = smov (%p42_p9, %s41_s8), 0  ;;  %s2337_s1 = smov (!%p42_p9, %s44_s1), %s1603_s21 }
  0x45   : > { %2265 = sst [smem:[#allocation26_spill]] %s2335_s8  ;;  %p2266_p5 = scmp.eq.s32.totalorder %s1607_s22, 0 }
  0x46   : > { %p65_p6 = scmp.eq.s32.totalorder %s1804_s6, 0  ;;  %p46_p8 = scmp.ge.s32.totalorder %s2337_s1, 2 }
  0x47   : > { %p1822_p3 = por %p2266_p5, %p2225_p13  ;;  %s74_s9 = ssub.s32 %s1599_s20, %s2335_s8 }
  0x48   : > { %p1832_p10 = por %p65_p6, %p2224_p1  ;;  %p75_p11 = scmp.eq.s32.totalorder %s74_s9, 0 }
  0x49   : > { %s2339_s1 = smov (%p46_p8, %s2337_s1), 0  ;;  %s77_s28 = sadd.s32 1, %s1575_s14 }
  0x4a   : > { %s2268_s26 = scalar_select %p1832_p10, 1, 0 }
  0x4b   : > { %2269 = sst [smem:[#allocation27_spill]] %s2339_s1  ;;  %p90_p12 = scmp.ne.s32.totalorder %s1571_s13, %s1567_s12 }
  0x4c   : > { %s48_s27 = ssub.s32 %s1603_s21, %s2339_s1  ;;  %s178_s8 = sadd.s32 1, %s1563_s11 }
  0x4d   : > { %p49_p0 = scmp.eq.s32.totalorder %s48_s27, 0  ;;  %p1844_p9 = por %p90_p12, %p65_p6 }
  0x4e   : > { %s1849_s3 = scalar_select %p75_p11, %s1575_s14, %s77_s28  }
  0x4f   : > { %s2270_s7 = scalar_select %p1844_p9, 1, 0 }
  0x50   : > { %2271 = sst [smem:[#allocation28_spill]] %s1849_s3  ;;  %s175_s18 = sor.u32 %s74_s9, %s48_s27 }
  0x51   : > { %s1852_s19 = scalar_select %p49_p0, %s1587_s17, %s51_s5  }
  0x52   : > { %p188_p5 = scmp.ne.s32.totalorder %s1563_s11, %s1559_s10  ;;  %p176_p8 = scmp.eq.s32.totalorder %s175_s18, 0 }
  0x53   : > { %2272 = sst [smem:[#allocation29_spill]] %s1852_s19  ;;  %p189_p7 = scmp.eq.s32.totalorder %s1804_s6, 3 }
  0x54   : > { %p194_p1 = scmp.ne.s32.totalorder %s1559_s10, %s1555_s30  ;;  %s2273_s12 = sadd.s32 4294967294, %s1607_s22  }
  0x55   : > { %p195_p13 = scmp.eq.s32.totalorder %s2273_s12, 3  ;;  %p1864_p6 = por %p189_p7, %p188_p5 }
  0x56   : > { %s1862_s1 = scalar_select %p176_p8, %s1563_s11, %s178_s8  }
  0x57   : > { %s2275_s13 = scalar_select %p1864_p6, 1, 0 }
  0x58   : > { %2274 = sst [smem:[#allocation30_spill]] %s1862_s1  ;;  %p1868_p11 = por %p195_p13, %p194_p1 }
  0x59   : > { %p2278_p12 = scmp.ne.s32.totalorder %s1587_s17, %s1583_s16  ;;  %p2280_p9 = scmp.ne.s32.totalorder %s1583_s16, %s1579_s15 }
  0x5a   : > { %s2276_s28 = scalar_select %p1868_p11, 1, 0 }
  0x5b   : > { %p1875_p0 = por %p189_p7, %p2278_p12  ;;  %p1882_p10 = por %p195_p13, %p2280_p9 }
  0x5c   : > { %2277 = sst [smem:[#allocation31_spill]] %s2276_s28  ;;  %s322_s8 = sand.u32 1, %s1587_s17  }
  0x5d   : > { %s2279_s27 = scalar_select %p1875_p0, 1, 0 }
  0x5e   : > { %s2281_s18 = scalar_select %p1882_p10, 1, 0 }
  0x5f   : > { %s1069_s5 = sshll.u32 %s1603_s21, 7  ;;  %s1068_s9 = sshll.u32 %s322_s8, 3 }
  0x60   : > { %2282 = sst [smem:[#allocation32_spill]] %s2281_s18  ;;  %s2283_s0 = sld [smem:[#allocation33_spill]] }
  0x61   : > { %s326_s14 = scalar_lea.vmem [#allocation3], %s1068_s9  ;;  %p2284_p7 = scmp.lt.s32.totalorder %s1607_s22, 4 }
  0x62   : > { %s333_s1 = sshll.u32 %s326_s14, 4  ;;  %s1113_s21 = sshll.u32 %s1599_s20, 10  ;;  %s1901_s1 = int_to_ptr.vmem [resolvable:$true] %s333_s1 }
  0x63   : > { %p1897_p13 = pnand %p2284_p7, %p1822_p3  ;;  %s323_s19 = scalar_lea.sflag [#allocation4], %s322_s8 }
  0x65   : > { %p1367_p9 = pneg %p1897_p13 }
  0x66   : > { %s1891_s3 = scalar_lea.hbm %s2283_s0, %s1069_s5  ;;  %s1370_s9 = scalar_lea.hbm %s2283_s0, 256 }
  0x67   : > { %s1365_s5 = scalar_lea.hbm %s1891_s3, 128  ;;  %p1371_p3 = scmp.lt.u32.totalorder %s1891_s3, %s2283_s0 }
  0x68   : > { %p1366_p1 = scmp.ne.s32.totalorder %s1891_s3, %s1365_s5  ;;  %p1372_p12 = scmp.lt.u32.totalorder %s1370_s9, %s1365_s5 }
  0x69   : > { %p1374_p10 = scmp.lt.u32.totalorder %s1365_s5, %s1891_s3 }
  0x6a   : > { %p1368_p5 = pnand %p1367_p9, %p1366_p1  ;;  %p1373_p7 = por %p1372_p12, %p1371_p3 }
  0x6c   : > { %p1369_p8 = pneg %p1368_p5  ;;  %p1375_p11 = por %p1374_p10, %p1373_p7 }
  0x6e   : > { %p1376_p0 = pnand %p1375_p11, %p1369_p8 }
  0x70   : > { %1379 = shalt.err (!%p1376_p0)
}
  0x71   : > { %s1380_s8 = scalar_lea.vmem %s1901_s1, 128  ;;  %s1613_s14 = smov [#allocation3]  }
  0x72   : > { %p1381_p1 = scmp.ne.s32.totalorder %s1901_s1, %s1380_s8  ;;  %s1385_s29 = sshll.u32 %s1613_s14, 4  ;;  %s1386_s29 = int_to_ptr.vmem [resolvable:$false] %s1385_s29 }
  0x73   : > { %s1387_s17 = scalar_lea.vmem %s1386_s29, 256  ;;  %p1388_p2 = scmp.lt.s32.totalorder %s1901_s1, %s1386_s29 }
  0x74   : > { %p1383_p5 = pnand %p1381_p1, %p1367_p9  ;;  %p1389_p3 = scmp.lt.s32.totalorder %s1387_s17, %s1380_s8 }
  0x76   : > { %p1384_p6 = pneg %p1383_p5  ;;  %p1390_p12 = por %p1389_p3, %p1388_p2 }
  0x78   : > { %p1391_p10 = pnand %p1390_p12, %p1384_p6 }
  0x7a   : > { %1394 = shalt.err (!%p1391_p10)
}
  0x7b   : > { %1185 = dma.hbm_to_vmem [thread:$0]  (!%p1897_p13), %s1891_s3, 128, %s1901_s1, %s323_s19  }
  0x7c   : > { %s2286_s2 = sld [smem:[#allocation35_spill]]  ;;  %s364_s8 = scalar_lea.vmem [#allocation8], %s1748_s25 }
  0x7d   : > { %s371_s14 = sshll.u32 %s364_s8, 4  ;;  %p2287_p6 = pneg %p1759_p4  ;;  %s1937_s14 = int_to_ptr.vmem [resolvable:$true] %s371_s14 }
  0x82   : > { %s1934_s12 = scalar_lea.hbm %s2286_s2, %s1113_s21  ;;  %s1400_s19 = scalar_lea.hbm %s2286_s2, 2048 }
  0x83   : > { %s1395_s11 = scalar_lea.hbm %s1934_s12, 1024  ;;  %p1401_p13 = scmp.lt.u32.totalorder %s1934_s12, %s2286_s2 }
  0x84   : > { %p1396_p2 = scmp.ne.s32.totalorder %s1934_s12, %s1395_s11  ;;  %p1402_p9 = scmp.lt.u32.totalorder %s1400_s19, %s1395_s11 }
  0x85   : > { %p1404_p7 = scmp.lt.u32.totalorder %s1395_s11, %s1934_s12 }
  0x86   : > { %p1398_p11 = pnand %p1396_p2, %p2287_p6  ;;  %p1403_p8 = por %p1402_p9, %p1401_p13 }
  0x88   : > { %p1399_p0 = pneg %p1398_p11  ;;  %p1405_p1 = por %p1404_p7, %p1403_p8 }
  0x8a   : > { %p1406_p5 = pnand %p1405_p1, %p1399_p0 }
  0x8c   : > { %1409 = shalt.err (!%p1406_p5)
}
  0x8d   : > { %s1410_s25 = scalar_lea.vmem %s1937_s14, 1024  ;;  %p2288_p12 = pmov %p2287_p6 }
  0x8e   : > { %p1411_p3 = scmp.ne.s32.totalorder %s1937_s14, %s1410_s25  ;;  %s1614_s17 = smov [#allocation8]  }
  0x8f   : > { %s1415_s5 = sshll.u32 %s1614_s17, 4  ;;  %s1416_s5 = int_to_ptr.vmem [resolvable:$false] %s1415_s5 }
  0x90   : > { %p1413_p10 = pnand %p1411_p3, %p2288_p12  ;;  %s1417_s9 = scalar_lea.vmem %s1416_s5, 2048 }
  0x91   : > { %p1418_p6 = scmp.lt.s32.totalorder %s1937_s14, %s1416_s5  ;;  %p1419_p11 = scmp.lt.s32.totalorder %s1417_s9, %s1410_s25 }
  0x92   : > { %p1414_p2 = pneg %p1413_p10 }
  0x93   : > { %p1420_p13 = por %p1419_p11, %p1418_p6 }
  0x95   : > { %p1421_p9 = pnand %p1420_p13, %p1414_p2 }
  0x97   : > { %1424 = shalt.err (!%p1421_p9)
}
  0x98   : > { %s2289_s8 = smov 4   ;;  %s2290_s11 = smov 64  }
  0x99   : > { %1191 = dma.hbm_to_vmem [thread:$0]  (!%p1759_p4), %s1934_s12, 1024, %s1937_s14, %s1766_s24, %s2290_s11, %s2290_s11, %s2289_s8  }
  0x9a   : > { %p2291_p0 = scmp.ne.s32.totalorder %s2264_s23, 0 }
  0x9b   : > { %s1969_s1 = sand.u32 (!%p2291_p0), 1, %s1583_s16   ;;  %p2292_p8 = scmp.ne.s32.totalorder (!%p2291_p0), %s2268_s26, 0 }
  0x9c   : > { %389 = sbr.rel (%p2291_p0) target bundleno = 875 (0x36b), region = 40  ;;  %s1076_s3 = sshll.u32 (!%p2291_p0), %s1969_s1, 3 }
  0x9d   : > { %s392_s19 = scalar_lea.sflag (!%p2291_p0), [#allocation4], %s1969_s1  ;;  %s1973_s21 = scalar_lea.vmem (!%p2291_p0), [#allocation3], %s1076_s3 }
  0xa3   : > { %1538 = dma.done.wait (%p2292_p8), %s392_s19, 128  }
  0xa4   : > { %1540 = vsyncadd (%p2292_p8), %s392_s19, 4294967168  ;;  %s2293_s4 = sld [smem:[#allocation17_spill]]  ;;  %s400_s24 = sand.u32 1, %s1804_s6  }
  0xa5   : > { %s401_s14 = scalar_lea.sflag [#allocation7], %s400_s24  ;;  %p2294_p4 = scmp.ne.s32.totalorder %s2270_s7, 0 }
  0xaa   : > { %s402_s23 = sand.u32 1, %s2293_s4  }
  0xab   : > { %s1077_s12 = sshll.u32 %s402_s23, 6 }
  0xac   : > { %s1981_s29 = scalar_lea.vmem [#allocation6], %s1077_s12 }
  0xad   : > { %1542 = dma.done.wait (%p2294_p4), %s401_s14, 2048  }
  0xae   : > { %1544 = vsyncadd (%p2294_p4), %s401_s14, 4294965248  ;;  %s2295_s25 = sld [smem:[#allocation22_spill]]  ;;  %s2296_s17 = sld [smem:[#allocation23_spill]] }
  0xaf   : > { %s2236_s26 = sand.u32 1, %s1559_s10   ;;  %s2297_s8 = sld [smem:[#allocation36_spill]] }
  0xb0   : > { %s1990_s5 = sshll.u32 %s2236_s26, 3  ;;  %s2298_s23 = sld [smem:[#allocation40_spill]] }
  0xb1   : > { %s2299_s2 = sld [smem:[#allocation41_spill]]  ;;  %s2300_s15 = sld [smem:[#allocation42_spill]] }
  0xb2   : > { %s2020_s9 = scalar_lea.vmem [#allocation8], %s1077_s12  ;;  %s2023_s7 = scalar_lea.vmem [#allocation10], %s1076_s3 }
  0xb4   : > { %p479_p7 = scmp.lt.s32.totalorder %s2295_s25, 1  ;;  %p482_p1 = scmp.lt.s32.totalorder %s2296_s17, 1 }
  0xb5   : > { %p1084_p5 = scmp.ne.s32.totalorder %s2295_s25, 0 }
  0xb6   : > { %s1995_s6 = scalar_select %p479_p7, %s2295_s25, 1 }
  0xb7   : > { %s2341_s17 = smov (!%p482_p1, %s2296_s17), 1  ;;  %498 = sbr.rel (%p1084_p5) target bundleno = 199 (0xc7), region = 56 }
  0xb8   : > { %s481_s11 = scalar_lea.vmem %s2297_s8, %s1995_s6  ;;  %s2002_s19 = sshll.u32 %s2341_s17, 3  ;;  %v499_v0 = vld [vmem:[%s1973_s21] sm:$0xff] (!%p1084_p5)  ;;  %vm511_vm0 = vcmask (!%p1084_p5), 7168   ;;  %v1615_v3 = vmov (!%p1084_p5), 0.0  }
  0xb9   : > { %s485_s14 = scalar_lea.vmem %s2298_s23, %s2002_s19  ;;  %s2012_s20 = scalar_lea.vmem %s2299_s2, %s2002_s19  ;;  %510 = vst [vmem:[%s2023_s7] sm:$0xff] (!%p1084_p5), %v1615_v3 }
  0xba   : > { %s2018_s28 = scalar_lea.vmem %s2300_s15, %s2002_s19  ;;  %s452_s17 = scalar_lea.vmem [#allocation9], %s1990_s5  ;;  %512 = vst.msk [vmem:[%s2012_s20] sm:$0xff] (!%p1084_p5), %vm511_vm0, %v1615_v3 }
  0xbb   : > { %s2301_s26 = sld [smem:[#allocation37_spill]] (!%p1084_p5)  ;;  %513 = vst.msk [vmem:[%s2018_s28] sm:$0xff] (!%p1084_p5), %vm511_vm0, %v1615_v3 }
  0xc1   : > { %v1085_v1 = vld [vmem:[%s2301_s26] ss:$0 sm:$0xff] }
  0xc2   : > { %v507_v2 = vsub.f32 %v499_v0, %v1085_v1 }
  0xc4   : > { %v508_v4 = vpack.c.bf16 %v507_v2, %v507_v2 }
  0xc6   : > { %509 = vst [vmem:[#allocation2] sm:$0xf] %v508_v4 }
  0xc7 PF: > { %v1319_v5 = vld [vmem:[%s1981_s29] sm:$0xff]   ;;  %v1616_v6 = vmov 0.0   ;;  %v1320_v7 = vld [vmem:[%s1981_s29 + $0x8] sm:$0xff]   ;;  %vm1617_vm1 = vmmov 0   ;;  %v1321_v8 = vld [vmem:[%s1981_s29 + $0x10] sm:$0xff]   ;;  %vm631_vm3 = vcmask 7168  }
  0xc8   : > { %1132 = vmatprep.subr.bf16.mxu0 %v1616_v6  ;;  %1152 = vmatprep.subr.bf16.mxu1 %v1616_v6  ;;  %v1327_v9 = vld [vmem:[%s2020_s9] sm:$0xff]   ;;  %v1322_v10 = vld [vmem:[%s1981_s29 + $0x18] sm:$0xff]   ;;  %v1328_v11 = vld [vmem:[%s2020_s9 + $0x8] sm:$0xff]   ;;  %s2303_s3 = sld [smem:[#allocation22_spill]] }
  0xc9   : > { %1133 = vmatpush3.bf16.msra.mxu0 %v1319_v5  ;;  %1148 = vmatprep.mubr.msk.bf16.mxu0 %vm1617_vm1, %v1616_v6  ;;  %v1323_v12 = vld [vmem:[%s1981_s29 + $0x20] sm:$0xff]   ;;  %v1329_v13 = vld [vmem:[%s2020_s9 + $0x10] sm:$0xff]   ;;  %v1324_v14 = vld [vmem:[%s1981_s29 + $0x28] sm:$0xff]  }
  0xca   : > { %1134 = vmatprep.subr.bf16.mxu0 %v1616_v6  ;;  %1168 = vmatprep.mubr.msk.bf16.mxu1 %vm1617_vm1, %v1616_v6  ;;  %v1330_v15 = vld [vmem:[%s2020_s9 + $0x18] sm:$0xff]   ;;  %v1325_v16 = vld [vmem:[%s1981_s29 + $0x30] sm:$0xff]   ;;  %v1331_v17 = vld [vmem:[%s2020_s9 + $0x20] sm:$0xff]  }
  0xcb   : > { %1153 = vmatpush3.bf16.msra.mxu1 %v1327_v9  ;;  %v1326_v18 = vld [vmem:[%s1981_s29 + $0x38] sm:$0xff]   ;;  %v1332_v19 = vld [vmem:[%s2020_s9 + $0x28] sm:$0xff]   ;;  %v1333_v21 = vld [vmem:[%s2020_s9 + $0x30] sm:$0xff]  }
  0xcc   : > { %1154 = vmatprep.subr.bf16.mxu1 %v1616_v6  ;;  %v1334_v22 = vld [vmem:[%s2020_s9 + $0x38] sm:$0xff]   ;;  %v1086_v23 = vld [vmem:[%s481_s11] ss:$0 sm:$0xff] }
  0xcd   : > { %1135 = vmatpush3.bf16.msra.mxu0 %v1320_v7  ;;  %v514_v20 = vld [vmem:[#allocation2] sm:$0xf]  ;;  %v642_v38 = vld [vmem:[%s2023_s7] sm:$0xff] }
  0xce   : > { %1136 = vmatprep.subr.bf16.mxu0 %v1616_v6  ;;  %v627_v32 = vld [vmem:[%s2012_s20] sm:$0xff]  ;;  %p1104_p3 = scmp.ne.s32.totalorder %s2303_s3, 1 }
  0xcf   : > { %1155 = vmatpush3.bf16.msra.mxu1 %v1328_v11  ;;  %v633_v35 = vld [vmem:[%s2018_s28] sm:$0xff]  ;;  %s2304_s29 = sld [smem:[#allocation37_spill]] (!%p1104_p3) }
  0xd0   : > { %1156 = vmatprep.subr.bf16.mxu1 %v1616_v6  ;;  %v764_v46 = vld [vmem:[%s1973_s21] sm:$0xff] (!%p1104_p3) }
  0xd1   : > { %1137 = vmatpush3.bf16.msra.mxu0 %v1321_v8 }
  0xd2   : > { %1138 = vmatprep.subr.bf16.mxu0 %v1616_v6 }
  0xd3   : > { %1157 = vmatpush3.bf16.msra.mxu1 %v1329_v13 }
  0xd4   : > { %1158 = vmatprep.subr.bf16.mxu1 %v1616_v6 }
  0xd5   : > { %1139 = vmatpush3.bf16.msra.mxu0 %v1322_v10  ;;  %v1105_v45 = vld [vmem:[%s2304_s29] ss:$0 sm:$0xff] (!%p1104_p3) }
  0xd6   : > { %1140 = vmatprep.subr.bf16.mxu0 %v1616_v6 }
  0xd7   : > { %1159 = vmatpush3.bf16.msra.mxu1 %v1330_v15 }
  0xd8   : > { %1160 = vmatprep.subr.bf16.mxu1 %v1616_v6 }
  0xd9   : > { %1141 = vmatpush3.bf16.msra.mxu0 %v1323_v12 }
  0xda   : > { %1142 = vmatprep.subr.bf16.mxu0 %v1616_v6 }
  0xdb   : > { %1161 = vmatpush3.bf16.msra.mxu1 %v1331_v17 }
  0xdc   : > { %1162 = vmatprep.subr.bf16.mxu1 %v1616_v6 }
  0xdd   : > { %1143 = vmatpush3.bf16.msra.mxu0 %v1324_v14 }
  0xde   : > { %1144 = vmatprep.subr.bf16.mxu0 %v1616_v6 }
  0xdf   : > { %1163 = vmatpush3.bf16.msra.mxu1 %v1332_v19 }
  0xe0   : > { %1164 = vmatprep.subr.bf16.mxu1 %v1616_v6 }
  0xe1   : > { %1145 = vmatpush3.bf16.msra.mxu0 %v1325_v16 }
  0xe2   : > { %1146 = vmatprep.subr.bf16.mxu0 %v1616_v6 }
  0xe3   : > { %1165 = vmatpush3.bf16.msra.mxu1 %v1333_v21 }
  0xe4   : > { %1166 = vmatprep.subr.bf16.mxu1 %v1616_v6 }
  0xe5   : > { %1147 = vmatpush3.bf16.msra.mxu0 %v1326_v18 }
  0xe7   : > { %1167 = vmatpush3.bf16.msra.mxu1 %v1334_v22 }
  0xe8   : > { %1149 = vmatmul.mubr.bf16.vlgmr.msra.gmra.mrb[0].mxu0 %v514_v20 }
 0x1bb   : > { %v620_v24 = vpop.f32.mrb[0].mxu0 }
 0x1bc   : > { %v621_v25 = vadd.f32 %v1086_v23, %v620_v24  ;;  %v1150_v26 = vpop.f32.mrb[1].mxu0 }
 0x1bd   : > { %v623_v27 = vpop.f32.mrb[2].mxu0 }
 0x1be   : > { %v626_v28 = vmax.f32 %v621_v25, 0.0  ;;  %v1151_v29 = vpop.f32.mrb[3].mxu0 }
 0x1c0   : > { %641 = vst [vmem:[%s452_s17] sm:$0xff] %v626_v28  ;;  %628 = vadd.xlane.f32.xlu0 %v626_v28  ;;  %v643_v30 = vpack.c.bf16 %v626_v28, %v626_v28  ;;  %vm634_vm2 = vcmp.gt.f32.partialorder %v626_v28, 1e-06 }
 0x1c1   : > { %v1095_v31 = vsel %vm634_vm2, 1.0, %v1616_v6 }
 0x1c2   : > { %1169 = vmatmul.mubr.bf16.vlgmr.msra.gmra.mrb[0].mxu1 %v643_v30 }
 0x1c4   : > { %637 = vadd.xlane.f32.xlu0 %v1095_v31 }
 0x24d   : > { %v629_v33 = vpop.xlane.xlu0 %628 }
 0x24e   : > { %v630_v34 = vadd.f32 %v629_v33, %v627_v32 }
 0x250   : > { %632 = vst.msk [vmem:[%s2012_s20] sm:$0xff] %vm631_vm3, %v630_v34 }
 0x251   : > { %v638_v36 = vpop.xlane.xlu0 %637 }
 0x252   : > { %v639_v37 = vadd.f32 %v638_v36, %v633_v35 }
 0x254   : > { %640 = vst.msk [vmem:[%s2018_s28] sm:$0xff] %vm631_vm3, %v639_v37 }
 0x292   : > { %753 = sbr.rel (%p1104_p3) target bundleno = 821 (0x335), region = 60 }
 0x295   : > { %v742_v39 = vpop.f32.mrb[0].mxu1 }
 0x296   : > { %v748_v40 = vadd.f32 %v742_v39, %v642_v38  ;;  %v1170_v41 = vpop.f32.mrb[1].mxu1 }
 0x297   : > { %v745_v42 = vpop.f32.mrb[2].mxu1 }
 0x298   : > { %749 = vst [vmem:[%s2023_s7] sm:$0xff] %v748_v40  ;;  %v1171_v43 = vpop.f32.mrb[3].mxu1 }
 0x29f   : > { %v754_v44 = vld [vmem:[%s2023_s7] sm:$0xff] }
 0x2a0   : > { %v762_v47 = vadd.f32 %v1105_v45, %v754_v44 }
 0x2a2   : > { %763 = vst [vmem:[%s2023_s7] sm:$0xff] %v762_v47  ;;  %v765_v48 = vsub.f32 %v762_v47, %v764_v46 }
 0x2a4   : > { %v766_v49 = vmul.f32 %v765_v48, %v765_v48 }
 0x2a6   : > { %767 = vadd.xlane.f32.xlu0 %v766_v49 }
 0x333   : > { %v768_v50 = vpop.xlane.xlu0 %767 }
 0x334   : > { %769 = vst.msk [vmem:[%s485_s14] sm:$0xff] %vm631_vm3, %v768_v50 }
 0x335 PF: > { %s2306_s8 = sld [smem:[#allocation23_spill]]  ;;  %s2307_s11 = sld [smem:[#allocation22_spill]] }
 0x336   : > { %s803_s24 = sshll.u32 %s452_s17, 4  ;;  %s2308_s2 = sld [smem:[#allocation38_spill]]  ;;  %s2100_s24 = int_to_ptr.vmem [resolvable:$true] %s803_s24 }
 0x337   : > { %s2309_s14 = sand.u32 1, %s1559_s10   ;;  %s1425_s15 = scalar_lea.vmem %s2100_s24, 128 }
 0x338   : > { %s771_s26 = scalar_lea.sflag [#allocation5], %s2309_s14  ;;  %p1426_p12 = scmp.ne.s32.totalorder %s2100_s24, %s1425_s15 }
 0x339   : > { %p2310_p10 = scmp.ne.s32.totalorder %s2275_s13, 0  ;;  %s1618_s16 = smov [#allocation9]  }
 0x33a   : > { %s1429_s5 = sshll.u32 %s1618_s16, 4  ;;  %s1430_s5 = int_to_ptr.vmem [resolvable:$false] %s1429_s5 }
 0x33b   : > { %s1108_s4 = sshll.u32 %s2306_s8, 1  ;;  %p1427_p2 = pnand %p1426_p12, %p2310_p10 }
 0x33c   : > { %s799_s21 = sadd.s32 %s2307_s11, %s1108_s4  ;;  %s1431_s17 = scalar_lea.vmem %s1430_s5, 256 }
 0x33d   : > { %s1109_s23 = sshll.u32 %s799_s21, 7  ;;  %p1428_p6 = pneg %p1427_p2 }
 0x33e   : > { %s801_s19 = scalar_lea.hbm %s2308_s2, %s1109_s23  ;;  %p1432_p11 = scmp.lt.s32.totalorder %s2100_s24, %s1430_s5 }
 0x33f   : > { %p1433_p13 = scmp.lt.s32.totalorder %s1431_s17, %s1425_s15 }
 0x341   : > { %p1434_p9 = por %p1433_p13, %p1432_p11 }
 0x343   : > { %p1435_p0 = pnand %p1434_p9, %p1428_p6 }
 0x345   : > { %1438 = shalt.err (!%p1435_p0)
}
 0x346   : > { %s1439_s18 = scalar_lea.hbm %s801_s19, 128  ;;  %s1443_s12 = scalar_lea.hbm %s2308_s2, 512 }
 0x347   : > { %p1440_p8 = scmp.ne.s32.totalorder %s801_s19, %s1439_s18  ;;  %p1444_p1 = scmp.lt.u32.totalorder %s801_s19, %s2308_s2 }
 0x348   : > { %p1445_p5 = scmp.lt.u32.totalorder %s1443_s12, %s1439_s18  ;;  %p1447_p12 = scmp.lt.u32.totalorder %s1439_s18, %s801_s19 }
 0x349   : > { %p1441_p4 = pnand %p1440_p8, %p2310_p10 }
 0x34a   : > { %p1446_p3 = por %p1445_p5, %p1444_p1 }
 0x34b   : > { %p1442_p7 = pneg %p1441_p4 }
 0x34c   : > { %p1448_p2 = por %p1447_p12, %p1446_p3 }
 0x34e   : > { %p1449_p6 = pnand %p1448_p2, %p1442_p7 }
 0x350   : > { %1452 = shalt.err (!%p1449_p6)
}
 0x351   : > { %1178 = dma.vmem_to_hbm [thread:$0]  (%p2310_p10), %s2100_s24, 128, %s801_s19, %s771_s26  }
 0x352   : > { %s1110_s25 = sshll.u32 %s2306_s8, 7  ;;  %s816_s6 = sshll.u32 %s2023_s7, 4  ;;  %s817_s6 = int_to_ptr.vmem [resolvable:$true] %s816_s6 }
 0x353   : > { %s2311_s21 = sld [smem:[#allocation39_spill]]  ;;  %s776_s0 = scalar_lea.sflag [#allocation11], %s1969_s1 }
 0x354   : > { %s1453_s14 = scalar_lea.vmem %s817_s6, 128  ;;  %p2313_p13 = scmp.ne.s32.totalorder %s2279_s27, 0 }
 0x355   : > { %p1454_p11 = scmp.ne.s32.totalorder %s817_s6, %s1453_s14  ;;  %s1619_s13 = smov [#allocation10]  }
 0x356   : > { %s1457_s15 = sshll.u32 %s1619_s13, 4  ;;  %s1458_s15 = int_to_ptr.vmem [resolvable:$false] %s1457_s15 }
 0x357   : > { %p1455_p9 = pnand %p1454_p11, %p2313_p13  ;;  %s1459_s16 = scalar_lea.vmem %s1458_s15, 256 }
 0x358   : > { %p1460_p8 = scmp.lt.s32.totalorder %s817_s6, %s1458_s15  ;;  %p1461_p10 = scmp.lt.s32.totalorder %s1459_s16, %s1453_s14 }
 0x359   : > { %s2312_s23 = smov %s2311_s21  ;;  %s2128_s9 = scalar_lea.hbm %s2311_s21, %s1110_s25 }
 0x35a   : > { %p1456_p0 = pneg %p1455_p9  ;;  %p1462_p4 = por %p1461_p10, %p1460_p8 }
 0x35c   : > { %p1463_p7 = pnand %p1462_p4, %p1456_p0 }
 0x35e   : > { %1466 = shalt.err (!%p1463_p7)
}
 0x35f   : > { %s1467_s1 = scalar_lea.hbm %s2128_s9, 128  ;;  %s1471_s24 = scalar_lea.hbm %s2312_s23, 256 }
 0x360   : > { %p1468_p1 = scmp.ne.s32.totalorder %s2128_s9, %s1467_s1  ;;  %p1472_p12 = scmp.lt.u32.totalorder %s2128_s9, %s2312_s23 }
 0x361   : > { %p1473_p2 = scmp.lt.u32.totalorder %s1471_s24, %s1467_s1  ;;  %p1475_p11 = scmp.lt.u32.totalorder %s1467_s1, %s2128_s9 }
 0x362   : > { %p1469_p5 = pnand %p1468_p1, %p2313_p13 }
 0x363   : > { %p1474_p6 = por %p1473_p2, %p1472_p12 }
 0x364   : > { %p1470_p3 = pneg %p1469_p5 }
 0x365   : > { %p1476_p9 = por %p1475_p11, %p1474_p6 }
 0x367   : > { %p1477_p0 = pnand %p1476_p9, %p1470_p3 }
 0x369   : > { %1480 = shalt.err (!%p1477_p0)
}
 0x36a   : > { %1179 = dma.vmem_to_hbm [thread:$0]  (%p2313_p13), %s817_s6, 128, %s2128_s9, %s776_s0  }
 0x36b PF: > { %s2314_s5 = sld [smem:[#allocation31_spill]]  ;;  %p1200_p8 = scmp.ge.s32.totalorder %s1607_s22, 2 }
 0x36c   : > { %s837_s17 = sand.u32 1, %s1555_s30  }
 0x36d   : > { %s838_s18 = scalar_lea.sflag [#allocation5], %s837_s17 }
 0x371   : > { %p2315_p10 = scmp.ne.s32.totalorder %s2314_s5, 0 }
 0x373   : > { %p1193_p4 = pnand %p1200_p8, %p2315_p10 }
 0x375   : > { %1546 = dma.done.wait (!%p1193_p4), %s838_s18, 128  }
 0x376   : > { %1548 = vsyncadd (!%p1193_p4), %s838_s18, 4294967168  ;;  %s2316_s3 = sld [smem:[#allocation19_spill]]  ;;  %s2317_s20 = sld [smem:[#allocation32_spill]] }
 0x37c   : > { %s846_s12 = sand.u32 1, %s2316_s3   ;;  %p2318_p7 = scmp.ne.s32.totalorder %s2317_s20, 0 }
 0x37d   : > { %s847_s29 = scalar_lea.sflag [#allocation11], %s846_s12 }
 0x37e   : > { %p1196_p1 = pnand %p1200_p8, %p2318_p7 }
 0x380   : > { %1550 = dma.done.wait (!%p1196_p1), %s847_s29, 128  }
 0x381   : > { %1552 = vsyncadd (!%p1196_p1), %s847_s29, 4294967168  ;;  %s32_s22 = sadd.s32 1, %s1607_s22   ;;  %s2320_s28 = sld [smem:[#allocation16_spill]] }
 0x382   : > { %p2156_p13 = scmp.ge.s32.totalorder %s32_s22, 6   ;;  %s2321_s11 = sld [smem:[#allocation30_spill]] }
 0x383   : > { %s2322_s12 = sld [smem:[#allocation17_spill]]  ;;  %s2323_s13 = sld [smem:[#allocation18_spill]] }
 0x384   : > { %s2324_s14 = sld [smem:[#allocation28_spill]]  ;;  %s2325_s15 = sld [smem:[#allocation20_spill]] }
 0x385   : > { %s2326_s16 = sld [smem:[#allocation21_spill]]  ;;  %s2327_s17 = sld [smem:[#allocation29_spill]] }
 0x386   : > { %s2328_s18 = sld [smem:[#allocation24_spill]]  ;;  %s2329_s19 = sld [smem:[#allocation25_spill]] }
 0x387   : > { %s2330_s20 = sld [smem:[#allocation26_spill]]  ;;  %s2331_s21 = sld [smem:[#allocation27_spill]] }
 0x388   : > { %s2332_s30 = smov %s1559_s10  ;;  %s2333_s10 = smov %s2320_s28 }
 0x389   :  { %31 = sbr.rel (!%p2156_p13) target bundleno = 25 (0x19), region = 173 }
 0x390   :  { %873 = vsyncpa [#allocation4], 1 }
 0x391   :  { %875 = vsyncpa [#allocation4 + $0x1], 1 }
 0x392   :  { %876 = vsyncpa [#allocation7], 1 }
 0x393   :  { %878 = vsyncpa [#allocation7 + $0x1], 1 }
 0x394   :  { %879 = vsyncpa [#allocation5], 1 }
 0x395   :  { %881 = vsyncpa [#allocation5 + $0x1], 1 }
 0x396   :  { %882 = vsyncpa [#allocation11], 1 }
 0x397   :  { %884 = vsyncpa [#allocation11 + $0x1], 1 }

</bundles_post_ra>
